<compile_context>
chip_gen: v7x
topology: tpu7x:2x2x1
jax: 0.10.0
libtpu: 0.0.40
codegen_flags: <defaults>
</compile_context>

<pallas_src>
import functools

import jax
import jax.numpy as jnp
from jax.experimental import pallas as pl
from jax.experimental.pallas import tpu as pltpu


def _fused_mlp_kernel(x_ref, w_ref, b_ref, o_ref, act_ref, acc_ref):
    """Grid = (layer l, output-column tile j, reduction tile k); k innermost.

    x_ref:   (1, M, t)   k-th chunk of the HBM input activation (used at layer 0).
    w_ref:   (1, t, t)   weight tile W_l[k*t:(k+1)*t, j*t:(j+1)*t]  (in, out layout).
    b_ref:   (1, 1, t)   bias tile b_l[j*t:(j+1)*t].
    o_ref:   (1, M, t)   per-layer output tile (only the last layer is consumed).
    act_ref: (2*nk, M, t) ping-pong activation scratch; layer parity picks the half.
    acc_ref: (M, t)      f32 accumulator for the current (l, j) output tile.
    """
    l = pl.program_id(0)
    j = pl.program_id(1)
    k = pl.program_id(2)
    nk = pl.num_programs(2)

    rd = ((l + 1) % 2) * nk   # base of the half holding this layer's input
    wr = (l % 2) * nk         # base of the half receiving this layer's output

    # Stage the HBM input into the ping-pong scratch exactly once (layer 0, first
    # pass over j): chunk k lands right before it is consumed below.
    @pl.when(jnp.logical_and(l == 0, j == 0))
    def _():
        act_ref[rd + k] = x_ref[0].astype(act_ref.dtype)

    @pl.when(k == 0)
    def _():
        acc_ref[...] = jnp.zeros_like(acc_ref)

    acc_ref[...] += jnp.dot(
        act_ref[rd + k], w_ref[0], preferred_element_type=jnp.float32
    )

    @pl.when(k == nk - 1)
    def _():
        y = acc_ref[...] + b_ref[0].astype(jnp.float32)
        act_ref[wr + j] = y.astype(act_ref.dtype)   # feed next layer (stays in VMEM)
        o_ref[0] = y.astype(o_ref.dtype)            # per-layer HBM copy (tiny)


@functools.partial(
    jax.jit,
    static_argnames=("tile", "compute_dtype", "vmem_limit_bytes", "w_buffers"),
)
def fused_mlp_forward(x, w_stack, b_stack, *, tile=2048,
                      compute_dtype=jnp.bfloat16,
                      vmem_limit_bytes=48 * 1024 * 1024,
                      w_buffers=None):
    """y = (((x @ W0 + b0) @ W1 + b1) ...) for L stacked Linear layers.

    x:       (M, dim) activations.
    w_stack: (L, dim, dim) weights, already transposed to (in, out).
    b_stack: (L, 1, dim) biases (kept / added in f32).

    tile: square weight tile edge.  Guidance from the HBM-bound roofline:
      v7x : 2048 (bf16 -> 16 MiB double-buffered, fits 64 MiB VMEM)
      v6e : 2048-4096 with vmem_limit_bytes raised accordingly
      v5e : 1024-2048 (raise vmem_limit_bytes past the 16 MiB scoped default)
    Pass compute_dtype=jnp.float32 for exact f32 nn.Linear semantics.
    """
    L, K, N = w_stack.shape
    M, K2 = x.shape
    assert K == N == K2, (x.shape, w_stack.shape)
    tile = min(tile, K)
    assert K % tile == 0, "dim must be divisible by the tile size"
    assert tile == K or tile % 128 == 0, "tile must be a multiple of 128 (lane dim)"
    nk = K // tile
    # Whole activation stays VMEM-resident (2 ping-pong copies); for huge batches
    # add an outer parallel M grid axis instead of growing this scratch.
    assert 2 * M * K * jnp.dtype(compute_dtype).itemsize < 8 * 1024 * 1024, (
        "batch too large for the fused resident-activation kernel")

    xc = x.astype(compute_dtype)
    wc = w_stack.astype(compute_dtype)   # no-op if params already stored in bf16
    bc = b_stack.astype(jnp.float32)

    # Chunk x along K so each grid step DMAs only the (M, tile) slice it needs.
    x_chunks = jnp.swapaxes(xc.reshape(M, nk, tile), 0, 1)   # (nk, M, tile)

    w_spec_kwargs = {}
    if w_buffers is not None:   # optional deeper buffering if DMA is still exposed
        w_spec_kwargs["pipeline_mode"] = pl.Buffered(w_buffers)

    out = pl.pallas_call(
        _fused_mlp_kernel,
        out_shape=jax.ShapeDtypeStruct((L, M, N), jnp.float32),
        grid_spec=pltpu.PrefetchScalarGridSpec(
            num_scalar_prefetch=0,
            grid=(L, nk, nk),   # (layer, out-col tile j, reduction tile k)
            in_specs=[
                pl.BlockSpec((1, M, tile), lambda l, j, k: (k, 0, 0)),
                pl.BlockSpec((1, tile, tile), lambda l, j, k: (l, k, j),
                             **w_spec_kwargs),
                pl.BlockSpec((1, 1, tile), lambda l, j, k: (l, 0, j)),
            ],
            out_specs=pl.BlockSpec((1, M, tile), lambda l, j, k: (l, 0, j)),
            scratch_shapes=[
                pltpu.VMEM((2 * nk, M, tile), compute_dtype),   # ping-pong activation
                pltpu.VMEM((M, tile), jnp.float32),             # f32 accumulator
            ],
        ),
        compiler_params=pltpu.CompilerParams(
            # Layer-carried VMEM activation => every axis is sequential.
            dimension_semantics=("arbitrary", "arbitrary", "arbitrary"),
            vmem_limit_bytes=vmem_limit_bytes,
        ),
    )(x_chunks, wc, bc)
    return out[L - 1]


def init_params(key, dim, num_layers, param_dtype=jnp.float32):
    """Deterministic params mimicking nn.Linear's U(-1/sqrt(in), 1/sqrt(in)) init.

    Weights are pre-transposed to (in, out) and stacked to (L, dim, dim);
    biases stacked to (L, 1, dim).  Use param_dtype=jnp.bfloat16 in production to
    halve weight-storage HBM and skip the cast in fused_mlp_forward.
    """
    bound = 1.0 / (dim ** 0.5)
    ws, bs = [], []
    for i in range(num_layers):
        kw, kb = jax.random.split(jax.random.fold_in(key, i))
        ws.append(jax.random.uniform(kw, (dim, dim), jnp.float32, -bound, bound))
        bs.append(jax.random.uniform(kb, (1, dim), jnp.float32, -bound, bound))
    return jnp.stack(ws).astype(param_dtype), jnp.stack(bs).astype(jnp.float32)


def mlp_reference(x, w_stack, b_stack, compute_dtype=jnp.bfloat16):
    """Pure-jnp reference using the same bf16-weights / f32-accumulate recipe."""
    h = x.astype(compute_dtype)
    y = None
    for l in range(w_stack.shape[0]):
        y = jnp.dot(h, w_stack[l].astype(compute_dtype),
                    preferred_element_type=jnp.float32) + b_stack[l].astype(jnp.float32)
        h = y.astype(compute_dtype)
    return y


if __name__ == "__main__":
    # The PyTorch module hardcodes dim=8192 / 20 layers; keep the 20-layer
    # structure but use a small hidden dim so the demo stays light-weight.
    dim = 256
    num_layers = 20
    batch = 8

    key = jax.random.PRNGKey(0)
    kx, kp = jax.random.split(key)
    x = jax.random.normal(kx, (batch, dim), jnp.float32)
    w_stack, b_stack = init_params(kp, dim, num_layers)

    out = fused_mlp_forward(x, w_stack, b_stack)
    out = jax.block_until_ready(out)

    ref = mlp_reference(x, w_stack, b_stack, jnp.bfloat16)
    assert out.shape == (batch, dim)
    err = float(jnp.max(jnp.abs(out - ref)))
    scale = float(jnp.max(jnp.abs(ref))) + 1e-8
    assert err <= 5e-2 * scale, (err, scale)
    print("KERNEL_OK")
</pallas_src>

<mosaic_0001>
module attributes {stable_mosaic.version = 11 : i64} {
  func.func @_fused_mlp_kernel(%arg0: i32, %arg1: i32, %arg2: i32, %arg3: memref<1x8x256xbf16, #tpu.memory_space<vmem>>, %arg4: memref<1x256x256xbf16, #tpu.memory_space<vmem>>, %arg5: memref<1x1x256xf32, #tpu.memory_space<vmem>>, %arg6: memref<1x8x256xf32, #tpu.memory_space<vmem>>, %arg7: memref<2x8x256xbf16, #tpu.memory_space<vmem>>, %arg8: memref<8x256xf32, #tpu.memory_space<vmem>>) attributes {dimension_semantics = [#tpu.dimension_semantics<arbitrary>, #tpu.dimension_semantics<arbitrary>, #tpu.dimension_semantics<arbitrary>], iteration_bounds = array<i64: 20, 1, 1>, scalar_prefetch = 0 : i64, scratch_operands = 2 : i64, tpu.core_type = #tpu.core_type<tc>, window_params = [{transform_indices = @transform_0, window_bounds = array<i64: 1, 8, 256>}, {transform_indices = @transform_1, window_bounds = array<i64: 1, 256, 256>}, {transform_indices = @transform_2, window_bounds = array<i64: 1, 1, 256>}, {transform_indices = @transform_3, window_bounds = array<i64: 1, 8, 256>}]} {
    %c1_i32 = arith.constant 1 : i32
    %0 = arith.addi %arg0, %c1_i32 : i32
    %c2_i32 = arith.constant 2 : i32
    %c0_i32 = arith.constant 0 : i32
    %1 = arith.cmpi eq, %c2_i32, %c0_i32 : i32
    %c1_i32_0 = arith.constant 1 : i32
    %2 = arith.select %1, %c1_i32_0, %c2_i32 : i32
    %3 = arith.remsi %0, %2 : i32
    %c0_i32_1 = arith.constant 0 : i32
    %4 = arith.cmpi ne, %3, %c0_i32_1 : i32
    %c0_i32_2 = arith.constant 0 : i32
    %5 = arith.cmpi slt, %3, %c0_i32_2 : i32
    %c0_i32_3 = arith.constant 0 : i32
    %6 = arith.cmpi slt, %2, %c0_i32_3 : i32
    %7 = arith.xori %5, %6 : i1
    %8 = arith.andi %7, %4 : i1
    %9 = arith.addi %3, %2 : i32
    %10 = arith.select %8, %9, %3 : i32
    %c1_i32_4 = arith.constant 1 : i32
    %11 = arith.muli %10, %c1_i32_4 : i32
    %c2_i32_5 = arith.constant 2 : i32
    %c0_i32_6 = arith.constant 0 : i32
    %12 = arith.cmpi eq, %c2_i32_5, %c0_i32_6 : i32
    %c1_i32_7 = arith.constant 1 : i32
    %13 = arith.select %12, %c1_i32_7, %c2_i32_5 : i32
    %14 = arith.remsi %arg0, %13 : i32
    %c0_i32_8 = arith.constant 0 : i32
    %15 = arith.cmpi ne, %14, %c0_i32_8 : i32
    %c0_i32_9 = arith.constant 0 : i32
    %16 = arith.cmpi slt, %14, %c0_i32_9 : i32
    %c0_i32_10 = arith.constant 0 : i32
    %17 = arith.cmpi slt, %13, %c0_i32_10 : i32
    %18 = arith.xori %16, %17 : i1
    %19 = arith.andi %18, %15 : i1
    %20 = arith.addi %14, %13 : i32
    %21 = arith.select %19, %20, %14 : i32
    %c1_i32_11 = arith.constant 1 : i32
    %22 = arith.muli %21, %c1_i32_11 : i32
    %c0_i32_12 = arith.constant 0 : i32
    %23 = arith.cmpi eq, %arg0, %c0_i32_12 : i32
    %c0_i32_13 = arith.constant 0 : i32
    %24 = arith.cmpi eq, %arg1, %c0_i32_13 : i32
    %25 = arith.andi %23, %24 : i1
    %26 = arith.extui %25 : i1 to i32
    %c0_i32_14 = arith.constant 0 : i32
    %27 = arith.cmpi ne, %26, %c0_i32_14 : i32
    scf.if %27 {
      %c0_27 = arith.constant 0 : index
      %c0_28 = arith.constant 0 : index
      %c0_29 = arith.constant 0 : index
      %44 = vector.load %arg3[%c0_27, %c0_28, %c0_29] : memref<1x8x256xbf16, #tpu.memory_space<vmem>>, vector<1x8x256xbf16>
      %45 = vector.shape_cast %44 : vector<1x8x256xbf16> to vector<8x256xbf16>
      %46 = arith.addi %11, %arg2 : i32
      %47 = arith.index_cast %46 : i32 to index
      %c0_30 = arith.constant 0 : index
      %c0_31 = arith.constant 0 : index
      %48 = vector.load %arg7[%47, %c0_30, %c0_31] : memref<2x8x256xbf16, #tpu.memory_space<vmem>>, vector<1x8x256xbf16>
      %49 = vector.shape_cast %48 : vector<1x8x256xbf16> to vector<8x256xbf16>
      %50 = vector.shape_cast %45 : vector<8x256xbf16> to vector<1x8x256xbf16>
      tpu.vector_store %arg7[%47, %c0_30, %c0_31], %50 {strides = array<i32>} : memref<2x8x256xbf16, #tpu.memory_space<vmem>>, vector<1x8x256xbf16>,
    } else {
    }
    %c0_i32_15 = arith.constant 0 : i32
    %28 = arith.cmpi eq, %arg2, %c0_i32_15 : i32
    %29 = arith.extui %28 : i1 to i32
    %c0_i32_16 = arith.constant 0 : i32
    %30 = arith.cmpi ne, %29, %c0_i32_16 : i32
    scf.if %30 {
      %cst_27 = arith.constant 0.000000e+00 : f32
      %44 = vector.broadcast %cst_27 : f32 to vector<8x256xf32>
      %c0_28 = arith.constant 0 : index
      %c0_29 = arith.constant 0 : index
      %45 = vector.load %arg8[%c0_28, %c0_29] : memref<8x256xf32, #tpu.memory_space<vmem>>, vector<8x256xf32>
      tpu.vector_store %arg8[%c0_28, %c0_29], %44 {strides = array<i32>} : memref<8x256xf32, #tpu.memory_space<vmem>>, vector<8x256xf32>,
    } else {
    }
    %c0 = arith.constant 0 : index
    %c0_17 = arith.constant 0 : index
    %31 = vector.load %arg8[%c0, %c0_17] : memref<8x256xf32, #tpu.memory_space<vmem>>, vector<8x256xf32>
    %32 = arith.addi %11, %arg2 : i32
    %33 = arith.index_cast %32 : i32 to index
    %c0_18 = arith.constant 0 : index
    %c0_19 = arith.constant 0 : index
    %34 = vector.load %arg7[%33, %c0_18, %c0_19] : memref<2x8x256xbf16, #tpu.memory_space<vmem>>, vector<1x8x256xbf16>
    %35 = vector.shape_cast %34 : vector<1x8x256xbf16> to vector<8x256xbf16>
    %c0_20 = arith.constant 0 : index
    %c0_21 = arith.constant 0 : index
    %c0_22 = arith.constant 0 : index
    %36 = vector.load %arg4[%c0_20, %c0_21, %c0_22] : memref<1x256x256xbf16, #tpu.memory_space<vmem>>, vector<1x256x256xbf16>
    %37 = vector.shape_cast %36 : vector<1x256x256xbf16> to vector<256x256xbf16>
    %cst = arith.constant dense<0.000000e+00> : vector<8x256xf32>
    %38 = tpu.matmul %35, %37, %cst {dimension_numbers = #tpu.dot_dimension_numbers<[1], [0], [0], [1], [0, 0, 1, 1], [], []>} : vector<8x256xbf16>, vector<256x256xbf16>, vector<8x256xf32> -> vector<8x256xf32>
    %39 = arith.addf %31, %38 : vector<8x256xf32>
    %c0_23 = arith.constant 0 : index
    %c0_24 = arith.constant 0 : index
    %40 = vector.load %arg8[%c0_23, %c0_24] : memref<8x256xf32, #tpu.memory_space<vmem>>, vector<8x256xf32>
    tpu.vector_store %arg8[%c0_23, %c0_24], %39 {strides = array<i32>} : memref<8x256xf32, #tpu.memory_space<vmem>>, vector<8x256xf32>,
    %c0_i32_25 = arith.constant 0 : i32
    %41 = arith.cmpi eq, %arg2, %c0_i32_25 : i32
    %42 = arith.extui %41 : i1 to i32
    %c0_i32_26 = arith.constant 0 : i32
    %43 = arith.cmpi ne, %42, %c0_i32_26 : i32
    scf.if %43 {
      %c0_27 = arith.constant 0 : index
      %c0_28 = arith.constant 0 : index
      %44 = vector.load %arg8[%c0_27, %c0_28] : memref<8x256xf32, #tpu.memory_space<vmem>>, vector<8x256xf32>
      %c0_29 = arith.constant 0 : index
      %c0_30 = arith.constant 0 : index
      %c0_31 = arith.constant 0 : index
      %45 = vector.load %arg5[%c0_29, %c0_30, %c0_31] : memref<1x1x256xf32, #tpu.memory_space<vmem>>, vector<1x1x256xf32>
      %46 = vector.shape_cast %45 : vector<1x1x256xf32> to vector<1x256xf32>
      %47 = vector.broadcast %46 : vector<1x256xf32> to vector<8x256xf32>
      %48 = arith.addf %44, %47 : vector<8x256xf32>
      %49 = arith.truncf %48 : vector<8x256xf32> to vector<8x256xbf16>
      %50 = arith.addi %22, %arg1 : i32
      %51 = arith.index_cast %50 : i32 to index
      %c0_32 = arith.constant 0 : index
      %c0_33 = arith.constant 0 : index
      %52 = vector.load %arg7[%51, %c0_32, %c0_33] : memref<2x8x256xbf16, #tpu.memory_space<vmem>>, vector<1x8x256xbf16>
      %53 = vector.shape_cast %52 : vector<1x8x256xbf16> to vector<8x256xbf16>
      %54 = vector.shape_cast %49 : vector<8x256xbf16> to vector<1x8x256xbf16>
      tpu.vector_store %arg7[%51, %c0_32, %c0_33], %54 {strides = array<i32>} : memref<2x8x256xbf16, #tpu.memory_space<vmem>>, vector<1x8x256xbf16>,
      %c0_34 = arith.constant 0 : index
      %c0_35 = arith.constant 0 : index
      %c0_36 = arith.constant 0 : index
      %55 = vector.load %arg6[%c0_34, %c0_35, %c0_36] : memref<1x8x256xf32, #tpu.memory_space<vmem>>, vector<1x8x256xf32>
      %56 = vector.shape_cast %55 : vector<1x8x256xf32> to vector<8x256xf32>
      %57 = vector.shape_cast %48 : vector<8x256xf32> to vector<1x8x256xf32>
      tpu.vector_store %arg6[%c0_34, %c0_35, %c0_36], %57 {strides = array<i32>} : memref<1x8x256xf32, #tpu.memory_space<vmem>>, vector<1x8x256xf32>,
    } else {
    }
    return
  }
  func.func @transform_0(%arg0: i32, %arg1: i32, %arg2: i32) -> (i32, i32, i32) {
    %c0_i32 = arith.constant 0 : i32
    %c0_i32_0 = arith.constant 0 : i32
    %c0_i32_1 = arith.constant 0 : i32
    return %arg2, %c0_i32, %c0_i32_0 : i32, i32, i32
  }
  func.func @transform_1(%arg0: i32, %arg1: i32, %arg2: i32) -> (i32, i32, i32) {
    %c0_i32 = arith.constant 0 : i32
    return %arg0, %arg2, %arg1 : i32, i32, i32
  }
  func.func @transform_2(%arg0: i32, %arg1: i32, %arg2: i32) -> (i32, i32, i32) {
    %c0_i32 = arith.constant 0 : i32
    %c0_i32_0 = arith.constant 0 : i32
    return %arg0, %c0_i32, %arg1 : i32, i32, i32
  }
  func.func @transform_3(%arg0: i32, %arg1: i32, %arg2: i32) -> (i32, i32, i32) {
    %c0_i32 = arith.constant 0 : i32
    %c0_i32_0 = arith.constant 0 : i32
    return %arg0, %c0_i32, %arg1 : i32, i32, i32
  }
}

</mosaic_0001>

<bundles_post_ra>
// kernel: fused_mlp_forward.1
= control target key start
LH: loop header
LB: loop body
LE: loop exit
PB: predicated region body
PF: predicated region fallthrough
CT: control target
= control target key end

     0   :  { %s938_s12 = smov 0   ;;  %s940_s13 = smov 0   ;;  %s1034_s0 = inlined_call_operand.vmem [shape: bf16[1,8,256], index: 0, kind: input, shape index: {}]   ;;  %s1035_s1 = inlined_call_operand.vmem [shape: bf16[20,256,256], index: 1, kind: input, shape index: {}]   ;;  %s1036_s2 = inlined_call_operand.vmem [shape: f32[20,1,256], index: 2, kind: input, shape index: {}]   ;;  %s1037_s3 = inlined_call_operand.vmem [shape: f32[20,8,256], index: 3, kind: output, shape index: {}]  }
   0x1   :  { %s942_s14 = smov 0  }
   0x2 LB: > { %s32_s15 = sadd.s32 1, %s912_s13  ;;  %p757_p0 = scmp.ge.s32.totalorder %s916_s14, 1  ;;  %s916_s14 = sphi %s942_s14, %s13_s14   ;;  %s912_s13 = sphi %s940_s13, %s1039_s13   ;;  %s908_s12 = sphi %s938_s12, %s1038_s12  }
   0x3   : > { %p34_p1 = scmp.ge.s32.totalorder %s32_s15, 20  ;;  %p199_p2 = scmp.lt.s32.totalorder %s916_s14, 21 }
   0x5   : > { %s1041_s15 = smov (%p34_p1, %s32_s15), 0  ;;  %p200_p3 = pnand %p757_p0, %p199_p2 }
   0x6   : > { %p256_p4 = scmp.lt.s32.totalorder (!%p200_p3), %s908_s12, 19  ;;  %s289_s16 = sadd.s32 (!%p200_p3), 1, %s908_s12 }
   0x7   : > { %203 = sbr.rel (%p200_p3) target bundleno = 311 (0x137), region = 32  ;;  %s291_s17 = ssub.s32 (!%p200_p3), 0, %s289_s16 }
   0x8   : > { %p290_p5 = scmp.lt.s32.totalorder (!%p200_p3), %s289_s16, 0  ;;  %s763_s19 = smin.u32 (!%p200_p3), %s291_s17, %s289_s16 }
   0x9   : > { %s293_s29 = sand.u32 (!%p200_p3), 1, %s763_s19   ;;  %s303_s7 = ssub.s32 (!%p200_p3), 0, %s908_s12 }
   0xa   : > { %s294_s6 = ssub.s32 (!%p200_p3), 0, %s293_s29  ;;  %p314_p6 = scmp.eq.s32.totalorder (!%p200_p3), %s908_s12, 0 }
   0xb   : > { %p302_p8 = scmp.lt.s32.totalorder (!%p200_p3), %s908_s12, 0  ;;  %s766_s9 = smin.u32 (!%p200_p3), %s908_s12, %s303_s7 }
   0xc   : > { %s305_s10 = sand.u32 (!%p200_p3), 1, %s766_s9  }
   0xd   : > { %s306_s11 = ssub.s32 (!%p200_p3), 0, %s305_s10 }
   0xe   : > { %s257_s18 = scalar_select %p256_p4, %s908_s12, 19 }
   0xf   : > { %s1043_s6 = smov (!%p290_p5, %s294_s6), %s293_s29  ;;  %s1047_s11 = smov (!%p302_p8, %s306_s11), %s305_s10 }
  0x10   : > { %s813_s20 = sshll.u32 %s257_s18, 8  ;;  %s760_s21 = sshll.u32 %s257_s18, 1  ;;  %v320_v0 = vld [vmem:[%s1034_s0] sm:$0xff] (%p314_p6) }
  0x11   : > { %s964_s24 = scalar_lea.vmem %s1035_s1, %s813_s20  ;;  %s969_s27 = scalar_lea.vmem %s1036_s2, %s760_s21 }
  0x12   : > { %s814_s28 = sshll.u32 %s257_s18, 4  ;;  %p765_p7 = scmp.lt.s32.totalorder %s1043_s6, 0 }
  0x13   : > { %s974_s5 = scalar_lea.vmem %s1037_s3, %s814_s28  ;;  %s300_s8 = sadd.s32 2, %s1043_s6 }
  0x14   : > { %s1045_s8 = smov (!%p765_p7, %s300_s8), %s1043_s6  ;;  %p768_p9 = scmp.lt.s32.totalorder %s1047_s11, 0 }
  0x15   : > { %s312_s16 = sadd.s32 2, %s1047_s11  ;;  %319 = sbr.rel (!%p314_p6) target bundleno = 28 (0x1c), region = 36 }
  0x16   : > { %s1049_s16 = smov (!%p768_p9, %s312_s16), %s1047_s11  ;;  %s816_s19 = sshll.u32 (%p314_p6), %s1045_s8, 3 }
  0x17   : > { %s324_s20 = scalar_lea.vmem (%p314_p6), [#allocation2], %s816_s19 }
  0x18   : > { %325 = vst [vmem:[%s324_s20] sm:$0xff] (%p314_p6), %v320_v0 }
  0x1c PF: > { %v844_v1 = vld [vmem:[%s964_s24 + $0x4] ss:$8 sps:$4 sm:$0xff]   ;;  %v846_v2 = vld [vmem:[%s964_s24] ss:$8 sps:$4 sm:$0xff]   ;;  %v847_v3 = vld [vmem:[%s964_s24 + $0x14] ss:$8 sps:$4 sm:$0xff]   ;;  %v590_v36 = vlaneseq }
  0x1d   : > { %538 = vmatprep.subr.bf16.mxu0 %v844_v1  ;;  %v849_v4 = vld [vmem:[%s964_s24 + $0x10] ss:$8 sps:$4 sm:$0xff]   ;;  %v850_v5 = vld [vmem:[%s964_s24 + $0x24] ss:$8 sps:$4 sm:$0xff]   ;;  %v852_v6 = vld [vmem:[%s964_s24 + $0x20] ss:$8 sps:$4 sm:$0xff]  }
  0x1e   : > { %539 = vmatpush1.bf16.msra.mxu0 %v846_v2  ;;  %v853_v7 = vld [vmem:[%s964_s24 + $0x34] ss:$8 sps:$4 sm:$0xff]   ;;  %v855_v8 = vld [vmem:[%s964_s24 + $0x30] ss:$8 sps:$4 sm:$0xff]   ;;  %v856_v9 = vld [vmem:[%s964_s24 + $0x44] ss:$8 sps:$4 sm:$0xff]  }
  0x1f   : > { %540 = vmatprep.subr.bf16.mxu0 %v847_v3  ;;  %v858_v10 = vld [vmem:[%s964_s24 + $0x40] ss:$8 sps:$4 sm:$0xff]   ;;  %s817_s12 = sshll.u32 %s1045_s8, 3  ;;  %v859_v11 = vld [vmem:[%s964_s24 + $0x54] ss:$8 sps:$4 sm:$0xff]   ;;  %v591_v37 = vshrl.u32 %v590_v36, 7 }
  0x20   : > { %v861_v12 = vld [vmem:[%s964_s24 + $0x50] ss:$8 sps:$4 sm:$0xff]   ;;  %v862_v13 = vld [vmem:[%s964_s24 + $0x64] ss:$8 sps:$4 sm:$0xff]   ;;  %s337_s21 = scalar_lea.vmem [#allocation2], %s817_s12  ;;  %s819_s22 = sshll.u32 %s1049_s16, 3 }
  0x21   : > { %v338_v14 = vld [vmem:[%s337_s21] sm:$0xff]  ;;  %v865_v17 = vld [vmem:[%s964_s24 + $0x74] ss:$8 sps:$4 sm:$0xff]   ;;  %v867_v18 = vld [vmem:[%s964_s24 + $0x70] ss:$8 sps:$4 sm:$0xff]   ;;  %v592_v38 = vsub.s32 0, %v591_v37 }
  0x22   : > { %541 = vmatpush1.bf16.msra.mxu0 %v849_v4  ;;  %v775_v15 = vcombine.high %v338_v14, %v338_v14  ;;  %v864_v16 = vld [vmem:[%s964_s24 + $0x60] ss:$8 sps:$4 sm:$0xff]   ;;  %v868_v19 = vld [vmem:[%s964_s24 + $0x84] ss:$8 sps:$4 sm:$0xff]   ;;  %v871_v21 = vld [vmem:[%s964_s24 + $0x94] ss:$8 sps:$4 sm:$0xff]   ;;  %v774_v35 = vcombine.low %v338_v14, %v338_v14 }
  0x23   : > { %542 = vmatprep.subr.bf16.mxu0 %v850_v5  ;;  %v870_v20 = vld [vmem:[%s964_s24 + $0x80] ss:$8 sps:$4 sm:$0xff]   ;;  %v873_v22 = vld [vmem:[%s964_s24 + $0x90] ss:$8 sps:$4 sm:$0xff]   ;;  %v874_v23 = vld [vmem:[%s964_s24 + $0xa4] ss:$8 sps:$4 sm:$0xff]  }
  0x24   : > { %570 = vmatprep.mubr.bf16.mxu0 %v775_v15  ;;  %v876_v24 = vld [vmem:[%s964_s24 + $0xa0] ss:$8 sps:$4 sm:$0xff]   ;;  %v877_v25 = vld [vmem:[%s964_s24 + $0xb4] ss:$8 sps:$4 sm:$0xff]   ;;  %v879_v26 = vld [vmem:[%s964_s24 + $0xb0] ss:$8 sps:$4 sm:$0xff]  }
  0x25   : > { %v880_v27 = vld [vmem:[%s964_s24 + $0xc4] ss:$8 sps:$4 sm:$0xff]   ;;  %v882_v28 = vld [vmem:[%s964_s24 + $0xc0] ss:$8 sps:$4 sm:$0xff]   ;;  %v883_v29 = vld [vmem:[%s964_s24 + $0xd4] ss:$8 sps:$4 sm:$0xff]  }
  0x26   : > { %543 = vmatpush1.bf16.msra.mxu0 %v852_v6  ;;  %v885_v30 = vld [vmem:[%s964_s24 + $0xd0] ss:$8 sps:$4 sm:$0xff]   ;;  %v886_v31 = vld [vmem:[%s964_s24 + $0xe4] ss:$8 sps:$4 sm:$0xff]   ;;  %v888_v32 = vld [vmem:[%s964_s24 + $0xe0] ss:$8 sps:$4 sm:$0xff]  }
  0x27   : > { %544 = vmatprep.subr.bf16.mxu0 %v853_v7  ;;  %v889_v33 = vld [vmem:[%s964_s24 + $0xf4] ss:$8 sps:$4 sm:$0xff]   ;;  %v891_v34 = vld [vmem:[%s964_s24 + $0xf0] ss:$8 sps:$4 sm:$0xff]   ;;  %v588_v39 = vld [vmem:[%s969_s27] sm:$0x3] }
  0x28   : > { %v596_v40 = vsub.s32 1, %v591_v37  ;;  %v593_v41 = vrot.slane %v588_v39, %v592_v38  ;;  %s613_s23 = scalar_lea.vmem [#allocation2], %s819_s22 }
  0x2a   : > { %545 = vmatpush1.bf16.msra.mxu0 %v855_v8  ;;  %v597_v42 = vrot.slane %v588_v39, %v596_v40 }
  0x2b   : > { %546 = vmatprep.subr.bf16.mxu0 %v856_v9 }
  0x2e   : > { %547 = vmatpush1.bf16.msra.mxu0 %v858_v10 }
  0x2f   : > { %548 = vmatprep.subr.bf16.mxu0 %v859_v11 }
  0x32   : > { %549 = vmatpush1.bf16.msra.mxu0 %v861_v12 }
  0x33   : > { %550 = vmatprep.subr.bf16.mxu0 %v862_v13 }
  0x36   : > { %551 = vmatpush1.bf16.msra.mxu0 %v864_v16 }
  0x37   : > { %552 = vmatprep.subr.bf16.mxu0 %v865_v17 }
  0x3a   : > { %553 = vmatpush1.bf16.msra.mxu0 %v867_v18 }
  0x3b   : > { %554 = vmatprep.subr.bf16.mxu0 %v868_v19 }
  0x3e   : > { %555 = vmatpush1.bf16.msra.mxu0 %v870_v20 }
  0x3f   : > { %556 = vmatprep.subr.bf16.mxu0 %v871_v21 }
  0x42   : > { %557 = vmatpush1.bf16.msra.mxu0 %v873_v22 }
  0x43   : > { %558 = vmatprep.subr.bf16.mxu0 %v874_v23 }
  0x46   : > { %559 = vmatpush1.bf16.msra.mxu0 %v876_v24 }
  0x47   : > { %560 = vmatprep.subr.bf16.mxu0 %v877_v25 }
  0x4a   : > { %561 = vmatpush1.bf16.msra.mxu0 %v879_v26 }
  0x4b   : > { %562 = vmatprep.subr.bf16.mxu0 %v880_v27 }
  0x4e   : > { %563 = vmatpush1.bf16.msra.mxu0 %v882_v28 }
  0x4f   : > { %564 = vmatprep.subr.bf16.mxu0 %v883_v29 }
  0x52   : > { %565 = vmatpush1.bf16.msra.mxu0 %v885_v30 }
  0x53   : > { %566 = vmatprep.subr.bf16.mxu0 %v886_v31 }
  0x56   : > { %567 = vmatpush1.bf16.msra.mxu0 %v888_v32 }
  0x57   : > { %568 = vmatprep.subr.bf16.mxu0 %v889_v33 }
  0x5a   : > { %569 = vmatpush1.bf16.msra.mxu0 %v891_v34 }
  0x5d   : > { %571 = vmatmul.mubr.bf16.vlgmr.msra.gmra.mrb[0].mxu0 %v774_v35 }
 0x130   : > { %v572_v43 = vpop.f32.mrb[0].mxu0 }
 0x131   : > { %v600_v44 = vadd.f32 %v593_v41, %v572_v43  ;;  %v574_v45 = vpop.f32.mrb[1].mxu0 }
 0x132   : > { %v601_v46 = vadd.f32 %v597_v42, %v574_v45  ;;  %v576_v47 = vpop.f32.mrb[2].mxu0 }
 0x133   : > { %615 = vst [vmem:[%s974_s5] sm:$0xff] %v600_v44  ;;  %v577_v48 = vpop.f32.mrb[3].mxu0 }
 0x134   : > { %v818_v49 = vpack.c.bf16 %v601_v46, %v600_v44  ;;  %616 = vst [vmem:[%s974_s5 + $0x8] sm:$0xff] %v601_v46 }
 0x136   : > { %614 = vst [vmem:[%s613_s23] sm:$0xff] %v818_v49 }
 0x137 PF: > { %s13_s14 = sadd.s32 1, %s916_s14   ;;  %s1038_s12 = smov %s912_s13 }
 0x138   : > { %p10_p10 = scmp.ge.s32.totalorder %s13_s14, 22   ;;  %s1039_s13 = smov %s1041_s15 }
 0x13a   :  { %12 = sbr.rel (!%p10_p10) target bundleno = 2 (0x2), region = 83 }

</bundles_post_ra>
